<compile_context>
chip_gen: v7x
topology: tpu7x:2x2x1
jax: 0.10.0
libtpu: 0.0.40
codegen_flags: <defaults>
</compile_context>

<pallas_src>
import functools

import jax
import jax.numpy as jnp
from jax.experimental import pallas as pl
from jax.experimental.pallas import tpu as pltpu


B_PAD = 8  # sublane-aligned row padding for the tiny per-batch feature rows


def _round_up(x, m):
    return ((x + m - 1) // m) * m


# ---------------------------------------------------------------------------
# Fused forward kernel.
# Grid = (batch, HW // ROW_CHUNK); batch axis "parallel", chunk axis is the
# reduction.  Per chunk: conv (one bf16 MXU matmul, bias folded in) + ReLU +
# partial GAP (sublane sum into VMEM scratch).  On the last chunk of each
# batch: fused fc matmul -> [x_c | x_b], fused block-diagonal head matmul ->
# [y_c_concat | y_b_concat], lane-dense stores.
# ---------------------------------------------------------------------------
def _net_icl_fused_kernel(patches_ref, convw_ref, fcw_ref, fcb_ref,
                          headw_ref, headb_ref,
                          ycb_ref, xcb_ref, feat_ref,
                          *, chunks_per_batch, inv_hw):
    # patches_ref: (1, ROW_CHUNK, KPAD)  bf16 im2col rows of one batch element
    # convw_ref  : (KPAD, CF_PAD)        bf16, conv bias folded in at row 9*Cin
    # fcw_ref    : (CF_PAD, OUT2_PAD)    bf16, [fc_c | fc_b] pre-transposed
    # fcb_ref    : (1, OUT2_PAD)         f32
    # headw_ref  : (OUT2_PAD, 2*NPAD)    bf16, block-diagonal fused heads
    # headb_ref  : (1, 2*NPAD)           f32
    # ycb_ref    : (1, 8, 2*NPAD)        f32 out  (8 identical rows)
    # xcb_ref    : (1, 8, OUT2_PAD)      f32 out  (8 identical rows)
    # feat_ref   : (8, CF_PAD)           f32 VMEM scratch (GAP accumulator)
    k = pl.program_id(1)

    @pl.when(k == 0)
    def _init():
        feat_ref[...] = jnp.zeros_like(feat_ref)

    # conv + bias + ReLU: one bf16 K=128 matmul on the MXU (bias via ones col)
    conv = jnp.dot(patches_ref[0], convw_ref[...],
                   preferred_element_type=jnp.float32)        # (ROW_CHUNK, CF_PAD)
    conv = jnp.maximum(conv, 0.0)

    # partial global-average-pool: cross-sublane sum (XLU slot, MXU stays free)
    feat_ref[...] += jnp.sum(conv, axis=0, keepdims=True)      # broadcast to (8, CF_PAD)

    @pl.when(k == chunks_per_batch - 1)
    def _epilogue():
        feat = (feat_ref[...] * inv_hw).astype(jnp.bfloat16)   # mean, cast for MXU
        # fused feature branches: [x_c | x_b] in one matmul
        x_cb = jnp.dot(feat, fcw_ref[...],
                       preferred_element_type=jnp.float32) + fcb_ref[...]
        xcb_ref[0] = x_cb.astype(xcb_ref.dtype)
        # fused heads of both branches: one block-diagonal matmul
        y_cb = jnp.dot(x_cb.astype(jnp.bfloat16), headw_ref[...],
                       preferred_element_type=jnp.float32) + headb_ref[...]
        ycb_ref[0] = y_cb.astype(ycb_ref.dtype)


def _fused_call(patches, pk, batch, chunks_per_batch, row_chunk):
    kpad = patches.shape[-1]
    cf_pad = pk["conv_w"].shape[1]
    out2_pad = pk["fc_w"].shape[1]
    npad2 = pk["head_w"].shape[1]
    hw = chunks_per_batch * row_chunk

    kernel = functools.partial(_net_icl_fused_kernel,
                               chunks_per_batch=chunks_per_batch,
                               inv_hw=1.0 / float(hw))

    flops = 2 * batch * (hw * kpad * cf_pad
                         + B_PAD * cf_pad * out2_pad
                         + B_PAD * out2_pad * npad2)
    bytes_accessed = (patches.size * 2
                      + (pk["conv_w"].size + pk["fc_w"].size + pk["head_w"].size) * 2
                      + (pk["fc_b"].size + pk["head_b"].size) * 4
                      + batch * B_PAD * (npad2 + out2_pad) * 4)

    return pl.pallas_call(
        kernel,
        out_shape=(
            jax.ShapeDtypeStruct((batch, B_PAD, npad2), jnp.float32),    # [y_c|y_b]
            jax.ShapeDtypeStruct((batch, B_PAD, out2_pad), jnp.float32), # [x_c|x_b]
        ),
        grid_spec=pltpu.PrefetchScalarGridSpec(
            num_scalar_prefetch=0,
            grid=(batch, chunks_per_batch),
            in_specs=[
                pl.BlockSpec((1, row_chunk, kpad), lambda i, k: (i, k, 0)),
                pl.BlockSpec((kpad, cf_pad), lambda i, k: (0, 0)),
                pl.BlockSpec((cf_pad, out2_pad), lambda i, k: (0, 0)),
                pl.BlockSpec((1, out2_pad), lambda i, k: (0, 0)),
                pl.BlockSpec((out2_pad, npad2), lambda i, k: (0, 0)),
                pl.BlockSpec((1, npad2), lambda i, k: (0, 0)),
            ],
            out_specs=(
                pl.BlockSpec((1, B_PAD, npad2), lambda i, k: (i, 0, 0)),
                pl.BlockSpec((1, B_PAD, out2_pad), lambda i, k: (i, 0, 0)),
            ),
            scratch_shapes=[pltpu.VMEM((B_PAD, cf_pad), jnp.float32)],
        ),
        compiler_params=pltpu.CompilerParams(
            dimension_semantics=("parallel", "arbitrary")),
        cost_estimate=pl.CostEstimate(flops=flops, transcendentals=0,
                                      bytes_accessed=bytes_accessed),
    )(patches, pk["conv_w"], pk["fc_w"], pk["fc_b"],
      pk["head_w"], pk["head_b"])


# ---------------------------------------------------------------------------
# NET_ICL forward: XLA im2col (fused, lane-padded, bias ones column, bf16)
# -> one Pallas kernel -> wrapper-side splits.
# ---------------------------------------------------------------------------
@functools.partial(jax.jit,
                   static_argnames=("head_sizes", "out_size", "return_features"))
def net_icl_forward(packed, x_nchw, head_sizes, out_size, return_features=False):
    b, cin, h, w = x_nchw.shape
    hw = h * w
    kc = 9 * cin
    kpad = packed["conv_w"].shape[0]
    npad = packed["head_w"].shape[1] // 2

    row_chunk = 128 if hw % 128 == 0 else hw
    chunks_per_batch = hw // row_chunk

    # NCHW -> NHWC, zero-pad halo, im2col -> (B, HW, KPAD): columns [0:9*Cin]
    # are patches, column [9*Cin] is the ones column (folds conv bias into the
    # matmul), remaining columns zero-pad K to 128.  Single fused XLA op.
    x = jnp.transpose(x_nchw, (0, 2, 3, 1))
    xpad = jnp.pad(x, ((0, 0), (1, 1), (1, 1), (0, 0)))
    cols = [xpad[:, ky:ky + h, kx:kx + w, :].reshape(b, hw, cin)
            for ky in range(3) for kx in range(3)]
    cols.append(jnp.ones((b, hw, 1), x.dtype))
    if kpad > kc + 1:
        cols.append(jnp.zeros((b, hw, kpad - kc - 1), x.dtype))
    patches = jnp.concatenate(cols, axis=-1).astype(jnp.bfloat16)

    y_full, x_full = _fused_call(patches, packed, b, chunks_per_batch, row_chunk)
    y_full = y_full[:, 0, :]        # (B, 2*NPAD)
    x_full = x_full[:, 0, :]        # (B, OUT2_PAD)

    # split lane-dense concatenated outputs back into per-task heads / branches
    y_c, y_b = [], []
    off = 0
    for n in head_sizes:
        y_c.append(y_full[:, off:off + n])
        y_b.append(y_full[:, npad + off:npad + off + n])
        off += n
    if return_features:
        x_c = x_full[:, :out_size]
        x_b = x_full[:, out_size:2 * out_size]
        return y_c, y_b, x_c, x_b
    return y_c, y_b


# ---------------------------------------------------------------------------
# Parameter construction (PyTorch layout) + one-time host-side packing
# ---------------------------------------------------------------------------
def make_params(key, c_in, c_feat, out_size, head_sizes):
    ks = jax.random.split(key, 6 + 2 * len(head_sizes))
    p = {
        "conv_w": 0.1 * jax.random.normal(ks[0], (3, 3, c_in, c_feat), jnp.float32),
        "conv_b": 0.1 * jax.random.normal(ks[1], (c_feat,), jnp.float32),
        "fc_c_w": 0.1 * jax.random.normal(ks[2], (out_size, c_feat), jnp.float32),
        "fc_c_b": 0.1 * jax.random.normal(ks[3], (out_size,), jnp.float32),
        "fc_b_w": 0.1 * jax.random.normal(ks[4], (out_size, c_feat), jnp.float32),
        "fc_b_b": 0.1 * jax.random.normal(ks[5], (out_size,), jnp.float32),
        "heads_c": [],
        "heads_b": [],
    }
    for i, n in enumerate(head_sizes):
        kw = jax.random.split(ks[6 + 2 * i], 2)
        kb = jax.random.split(ks[7 + 2 * i], 2)
        p["heads_c"].append((0.1 * jax.random.normal(kw[0], (n, out_size), jnp.float32),
                             0.1 * jax.random.normal(kw[1], (n,), jnp.float32)))
        p["heads_b"].append((0.1 * jax.random.normal(kb[0], (n, out_size), jnp.float32),
                             0.1 * jax.random.normal(kb[1], (n,), jnp.float32)))
    return p


def pack_params(params):
    """One-time host-side packing:
      * conv weights flattened to (9*Cin, Cf), zero-padded to (128, 128),
        conv bias folded in as an extra K row (matches the ones column),
      * fc_c / fc_b pre-transposed and fused into one (128, 128) weight,
      * all heads of both branches fused into one block-diagonal (128, 2*NPAD)
        weight (x_c rows -> heads_c columns, x_b rows -> heads_b columns),
      * all matmul weights cast to bf16, biases kept f32."""
    cw = params["conv_w"]                       # (3, 3, Cin, Cf) HWIO
    cin, cf = cw.shape[2], cw.shape[3]
    kc = 9 * cin
    kpad = max(128, _round_up(kc + 1, 128))
    cf_pad = max(128, _round_up(cf, 128))
    out_size = int(params["fc_c_w"].shape[0])
    out2_pad = max(128, _round_up(2 * out_size, 128))
    head_sizes = tuple(int(w.shape[0]) for (w, _) in params["heads_c"])
    total = sum(head_sizes)
    npad = max(128, _round_up(total, 128))

    convw = jnp.zeros((kpad, cf_pad), jnp.float32)
    convw = convw.at[:kc, :cf].set(cw.reshape(kc, cf))
    convw = convw.at[kc, :cf].set(params["conv_b"])            # folded bias row

    fcw = jnp.zeros((cf_pad, out2_pad), jnp.float32)
    fcw = fcw.at[:cf, :out_size].set(params["fc_c_w"].T)
    fcw = fcw.at[:cf, out_size:2 * out_size].set(params["fc_b_w"].T)
    fcb = jnp.zeros((1, out2_pad), jnp.float32)
    fcb = fcb.at[0, :out_size].set(params["fc_c_b"])
    fcb = fcb.at[0, out_size:2 * out_size].set(params["fc_b_b"])

    hcw = jnp.concatenate([w for (w, _) in params["heads_c"]], axis=0)   # (total, out)
    hbw = jnp.concatenate([w for (w, _) in params["heads_b"]], axis=0)
    headw = jnp.zeros((out2_pad, 2 * npad), jnp.float32)
    headw = headw.at[:out_size, :total].set(hcw.T)
    headw = headw.at[out_size:2 * out_size, npad:npad + total].set(hbw.T)
    headb = jnp.zeros((1, 2 * npad), jnp.float32)
    headb = headb.at[0, :total].set(
        jnp.concatenate([b for (_, b) in params["heads_c"]]))
    headb = headb.at[0, npad:npad + total].set(
        jnp.concatenate([b for (_, b) in params["heads_b"]]))

    packed = {
        "conv_w": convw.astype(jnp.bfloat16),
        "fc_w": fcw.astype(jnp.bfloat16),
        "fc_b": fcb,
        "head_w": headw.astype(jnp.bfloat16),
        "head_b": headb,
    }
    return packed, head_sizes, out_size


# ---------------------------------------------------------------------------
# Pure-JAX reference (f32 end-to-end)
# ---------------------------------------------------------------------------
def reference_forward(params, x_nchw):
    x = jnp.transpose(x_nchw, (0, 2, 3, 1))
    conv = jax.lax.conv_general_dilated(
        x, params["conv_w"], window_strides=(1, 1), padding="SAME",
        dimension_numbers=("NHWC", "HWIO", "NHWC"))
    conv = jnp.maximum(conv + params["conv_b"], 0.0)
    feat = jnp.mean(conv, axis=(1, 2))
    x_c = feat @ params["fc_c_w"].T + params["fc_c_b"]
    x_b = feat @ params["fc_b_w"].T + params["fc_b_b"]
    y_c = [x_c @ w.T + b for (w, b) in params["heads_c"]]
    y_b = [x_b @ w.T + b for (w, b) in params["heads_b"]]
    return y_c, y_b, x_c, x_b


if __name__ == "__main__":
    B, C_IN, H, W = 2, 4, 16, 16
    C_FEAT, OUT_SIZE = 32, 32
    HEAD_SIZES = (5, 7)     # two tasks -> two heads per branch

    key = jax.random.PRNGKey(0)
    k_x, k_p = jax.random.split(key)
    x = jax.random.normal(k_x, (B, C_IN, H, W), jnp.float32)
    params = make_params(k_p, C_IN, C_FEAT, OUT_SIZE, HEAD_SIZES)
    packed, head_sizes, out_size = pack_params(params)

    y_c, y_b, x_c, x_b = net_icl_forward(packed, x, head_sizes, out_size,
                                         return_features=True)
    jax.block_until_ready((y_c, y_b, x_c, x_b))

    # correctness vs. plain-JAX f32 reference (kernel matmuls run in bf16)
    ry_c, ry_b, rx_c, rx_b = reference_forward(params, x)
    for got, ref in zip(y_c + y_b + [x_c, x_b], ry_c + ry_b + [rx_c, rx_b]):
        assert got.shape == ref.shape
        assert jnp.allclose(got, ref, atol=2e-2, rtol=2e-2)

    print("KERNEL_OK")
</pallas_src>

<mosaic_0001>
module attributes {stable_mosaic.version = 11 : i64} {
  func.func @_net_icl_fused_kernel(%arg0: i32, %arg1: i32, %arg2: memref<1x128x128xbf16, #tpu.memory_space<vmem>>, %arg3: memref<128x128xbf16, #tpu.memory_space<vmem>>, %arg4: memref<128x128xbf16, #tpu.memory_space<vmem>>, %arg5: memref<1x128xf32, #tpu.memory_space<vmem>>, %arg6: memref<128x256xbf16, #tpu.memory_space<vmem>>, %arg7: memref<1x256xf32, #tpu.memory_space<vmem>>, %arg8: memref<1x8x256xf32, #tpu.memory_space<vmem>>, %arg9: memref<1x8x128xf32, #tpu.memory_space<vmem>>, %arg10: memref<8x128xf32, #tpu.memory_space<vmem>>) attributes {dimension_semantics = [#tpu.dimension_semantics<parallel>, #tpu.dimension_semantics<arbitrary>], iteration_bounds = array<i64: 2, 2>, scalar_prefetch = 0 : i64, scratch_operands = 1 : i64, tpu.core_type = #tpu.core_type<tc>, window_params = [{transform_indices = @transform_0, window_bounds = array<i64: 1, 128, 128>}, {pipeline_mode = #tpu.pipeline_mode<synchronous>, transform_indices = @transform_1, window_bounds = array<i64: 128, 128>}, {pipeline_mode = #tpu.pipeline_mode<synchronous>, transform_indices = @transform_2, window_bounds = array<i64: 128, 128>}, {pipeline_mode = #tpu.pipeline_mode<synchronous>, transform_indices = @transform_3, window_bounds = array<i64: 1, 128>}, {pipeline_mode = #tpu.pipeline_mode<synchronous>, transform_indices = @transform_4, window_bounds = array<i64: 128, 256>}, {pipeline_mode = #tpu.pipeline_mode<synchronous>, transform_indices = @transform_5, window_bounds = array<i64: 1, 256>}, {transform_indices = @transform_6, window_bounds = array<i64: 1, 8, 256>}, {transform_indices = @transform_7, window_bounds = array<i64: 1, 8, 128>}]} {
    %c0_i32 = arith.constant 0 : i32
    %0 = arith.cmpi eq, %arg1, %c0_i32 : i32
    %1 = arith.extui %0 : i1 to i32
    %c0_i32_0 = arith.constant 0 : i32
    %2 = arith.cmpi ne, %1, %c0_i32_0 : i32
    scf.if %2 {
      %cst_12 = arith.constant 0.000000e+00 : f32
      %18 = vector.broadcast %cst_12 : f32 to vector<8x128xf32>
      %c0_13 = arith.constant 0 : index
      %c0_14 = arith.constant 0 : index
      %19 = vector.load %arg10[%c0_13, %c0_14] : memref<8x128xf32, #tpu.memory_space<vmem>>, vector<8x128xf32>
      tpu.vector_store %arg10[%c0_13, %c0_14], %18 {strides = array<i32>} : memref<8x128xf32, #tpu.memory_space<vmem>>, vector<8x128xf32>,
    } else {
    }
    %c0 = arith.constant 0 : index
    %c0_1 = arith.constant 0 : index
    %c0_2 = arith.constant 0 : index
    %3 = vector.load %arg2[%c0, %c0_1, %c0_2] : memref<1x128x128xbf16, #tpu.memory_space<vmem>>, vector<1x128x128xbf16>
    %4 = vector.shape_cast %3 : vector<1x128x128xbf16> to vector<128x128xbf16>
    %c0_3 = arith.constant 0 : index
    %c0_4 = arith.constant 0 : index
    %5 = vector.load %arg3[%c0_3, %c0_4] : memref<128x128xbf16, #tpu.memory_space<vmem>>, vector<128x128xbf16>
    %cst = arith.constant dense<0.000000e+00> : vector<128x128xf32>
    %6 = tpu.matmul %4, %5, %cst {dimension_numbers = #tpu.dot_dimension_numbers<[1], [0], [0], [1], [0, 0, 1, 1], [], []>} : vector<128x128xbf16>, vector<128x128xbf16>, vector<128x128xf32> -> vector<128x128xf32>
    %cst_5 = arith.constant 0.000000e+00 : f32
    %7 = vector.broadcast %cst_5 : f32 to vector<128x128xf32>
    %8 = arith.maximumf %6, %7 : vector<128x128xf32>
    %c0_6 = arith.constant 0 : index
    %c0_7 = arith.constant 0 : index
    %9 = vector.load %arg10[%c0_6, %c0_7] : memref<8x128xf32, #tpu.memory_space<vmem>>, vector<8x128xf32>
    %cst_8 = arith.constant dense<0.000000e+00> : vector<128xf32>
    %10 = vector.multi_reduction <add>, %8, %cst_8 [0] : vector<128x128xf32> to vector<128xf32>
    %11 = vector.shape_cast %10 : vector<128xf32> to vector<1x128xf32>
    %12 = vector.broadcast %11 : vector<1x128xf32> to vector<8x128xf32>
    %13 = arith.addf %9, %12 : vector<8x128xf32>
    %c0_9 = arith.constant 0 : index
    %c0_10 = arith.constant 0 : index
    %14 = vector.load %arg10[%c0_9, %c0_10] : memref<8x128xf32, #tpu.memory_space<vmem>>, vector<8x128xf32>
    tpu.vector_store %arg10[%c0_9, %c0_10], %13 {strides = array<i32>} : memref<8x128xf32, #tpu.memory_space<vmem>>, vector<8x128xf32>,
    %c1_i32 = arith.constant 1 : i32
    %15 = arith.cmpi eq, %arg1, %c1_i32 : i32
    %16 = arith.extui %15 : i1 to i32
    %c0_i32_11 = arith.constant 0 : i32
    %17 = arith.cmpi ne, %16, %c0_i32_11 : i32
    scf.if %17 {
      %c0_12 = arith.constant 0 : index
      %c0_13 = arith.constant 0 : index
      %18 = vector.load %arg10[%c0_12, %c0_13] : memref<8x128xf32, #tpu.memory_space<vmem>>, vector<8x128xf32>
      %cst_14 = arith.constant 3.906250e-03 : f32
      %19 = vector.broadcast %cst_14 : f32 to vector<8x128xf32>
      %20 = arith.mulf %18, %19 : vector<8x128xf32>
      %21 = arith.truncf %20 : vector<8x128xf32> to vector<8x128xbf16>
      %c0_15 = arith.constant 0 : index
      %c0_16 = arith.constant 0 : index
      %22 = vector.load %arg4[%c0_15, %c0_16] : memref<128x128xbf16, #tpu.memory_space<vmem>>, vector<128x128xbf16>
      %cst_17 = arith.constant dense<0.000000e+00> : vector<8x128xf32>
      %23 = tpu.matmul %21, %22, %cst_17 {dimension_numbers = #tpu.dot_dimension_numbers<[1], [0], [0], [1], [0, 0, 1, 1], [], []>} : vector<8x128xbf16>, vector<128x128xbf16>, vector<8x128xf32> -> vector<8x128xf32>
      %c0_18 = arith.constant 0 : index
      %c0_19 = arith.constant 0 : index
      %24 = vector.load %arg5[%c0_18, %c0_19] : memref<1x128xf32, #tpu.memory_space<vmem>>, vector<1x128xf32>
      %25 = vector.broadcast %24 : vector<1x128xf32> to vector<8x128xf32>
      %26 = arith.addf %23, %25 : vector<8x128xf32>
      %c0_20 = arith.constant 0 : index
      %c0_21 = arith.constant 0 : index
      %c0_22 = arith.constant 0 : index
      %27 = vector.load %arg9[%c0_20, %c0_21, %c0_22] : memref<1x8x128xf32, #tpu.memory_space<vmem>>, vector<1x8x128xf32>
      %28 = vector.shape_cast %27 : vector<1x8x128xf32> to vector<8x128xf32>
      %29 = vector.shape_cast %26 : vector<8x128xf32> to vector<1x8x128xf32>
      tpu.vector_store %arg9[%c0_20, %c0_21, %c0_22], %29 {strides = array<i32>} : memref<1x8x128xf32, #tpu.memory_space<vmem>>, vector<1x8x128xf32>,
      %30 = arith.truncf %26 : vector<8x128xf32> to vector<8x128xbf16>
      %c0_23 = arith.constant 0 : index
      %c0_24 = arith.constant 0 : index
      %31 = vector.load %arg6[%c0_23, %c0_24] : memref<128x256xbf16, #tpu.memory_space<vmem>>, vector<128x256xbf16>
      %cst_25 = arith.constant dense<0.000000e+00> : vector<8x256xf32>
      %32 = tpu.matmul %30, %31, %cst_25 {dimension_numbers = #tpu.dot_dimension_numbers<[1], [0], [0], [1], [0, 0, 1, 1], [], []>} : vector<8x128xbf16>, vector<128x256xbf16>, vector<8x256xf32> -> vector<8x256xf32>
      %c0_26 = arith.constant 0 : index
      %c0_27 = arith.constant 0 : index
      %33 = vector.load %arg7[%c0_26, %c0_27] : memref<1x256xf32, #tpu.memory_space<vmem>>, vector<1x256xf32>
      %34 = vector.broadcast %33 : vector<1x256xf32> to vector<8x256xf32>
      %35 = arith.addf %32, %34 : vector<8x256xf32>
      %c0_28 = arith.constant 0 : index
      %c0_29 = arith.constant 0 : index
      %c0_30 = arith.constant 0 : index
      %36 = vector.load %arg8[%c0_28, %c0_29, %c0_30] : memref<1x8x256xf32, #tpu.memory_space<vmem>>, vector<1x8x256xf32>
      %37 = vector.shape_cast %36 : vector<1x8x256xf32> to vector<8x256xf32>
      %38 = vector.shape_cast %35 : vector<8x256xf32> to vector<1x8x256xf32>
      tpu.vector_store %arg8[%c0_28, %c0_29, %c0_30], %38 {strides = array<i32>} : memref<1x8x256xf32, #tpu.memory_space<vmem>>, vector<1x8x256xf32>,
    } else {
    }
    return
  }
  func.func @transform_0(%arg0: i32, %arg1: i32) -> (i32, i32, i32) {
    %c0_i32 = arith.constant 0 : i32
    %c0_i32_0 = arith.constant 0 : i32
    return %arg0, %arg1, %c0_i32 : i32, i32, i32
  }
  func.func @transform_1(%arg0: i32, %arg1: i32) -> (i32, i32) {
    %c0_i32 = arith.constant 0 : i32
    %c0_i32_0 = arith.constant 0 : i32
    %c0_i32_1 = arith.constant 0 : i32
    return %c0_i32, %c0_i32_0 : i32, i32
  }
  func.func @transform_2(%arg0: i32, %arg1: i32) -> (i32, i32) {
    %c0_i32 = arith.constant 0 : i32
    %c0_i32_0 = arith.constant 0 : i32
    %c0_i32_1 = arith.constant 0 : i32
    return %c0_i32, %c0_i32_0 : i32, i32
  }
  func.func @transform_3(%arg0: i32, %arg1: i32) -> (i32, i32) {
    %c0_i32 = arith.constant 0 : i32
    %c0_i32_0 = arith.constant 0 : i32
    %c0_i32_1 = arith.constant 0 : i32
    return %c0_i32, %c0_i32_0 : i32, i32
  }
  func.func @transform_4(%arg0: i32, %arg1: i32) -> (i32, i32) {
    %c0_i32 = arith.constant 0 : i32
    %c0_i32_0 = arith.constant 0 : i32
    %c0_i32_1 = arith.constant 0 : i32
    return %c0_i32, %c0_i32_0 : i32, i32
  }
  func.func @transform_5(%arg0: i32, %arg1: i32) -> (i32, i32) {
    %c0_i32 = arith.constant 0 : i32
    %c0_i32_0 = arith.constant 0 : i32
    %c0_i32_1 = arith.constant 0 : i32
    return %c0_i32, %c0_i32_0 : i32, i32
  }
  func.func @transform_6(%arg0: i32, %arg1: i32) -> (i32, i32, i32) {
    %c0_i32 = arith.constant 0 : i32
    %c0_i32_0 = arith.constant 0 : i32
    %c0_i32_1 = arith.constant 0 : i32
    return %arg0, %c0_i32, %c0_i32_0 : i32, i32, i32
  }
  func.func @transform_7(%arg0: i32, %arg1: i32) -> (i32, i32, i32) {
    %c0_i32 = arith.constant 0 : i32
    %c0_i32_0 = arith.constant 0 : i32
    %c0_i32_1 = arith.constant 0 : i32
    return %arg0, %c0_i32, %c0_i32_0 : i32, i32, i32
  }
}

</mosaic_0001>

<bundles_post_ra>
// kernel: net_icl_forward.1
= control target key start
LH: loop header
LB: loop body
LE: loop exit
PB: predicated region body
PF: predicated region fallthrough
CT: control target
= control target key end

     0   :  { %s1289_s24 = smov 0   ;;  %s1291_s25 = smov 0   ;;  %s1467_s0 = inlined_call_operand.vmem [shape: bf16[2,256,128], index: 0, kind: input, shape index: {}]   ;;  %s1468_s1 = inlined_call_operand.vmem [shape: bf16[128,128], index: 1, kind: input, shape index: {}]   ;;  %s1469_s2 = inlined_call_operand.vmem [shape: bf16[128,128], index: 2, kind: input, shape index: {}]   ;;  %s1470_s3 = inlined_call_operand.vmem [shape: f32[1,128], index: 3, kind: input, shape index: {}]   ;;  %s1471_s4 = inlined_call_operand.vmem [shape: bf16[128,256], index: 4, kind: input, shape index: {}]   ;;  %s1472_s5 = inlined_call_operand.vmem [shape: f32[1,256], index: 5, kind: input, shape index: {}]   ;;  %s1473_s6 = inlined_call_operand.vmem [shape: f32[2,8,256], index: 6, kind: output, shape index: {0}]   ;;  %s1474_s7 = inlined_call_operand.vmem [shape: f32[2,8,128], index: 7, kind: output, shape index: {1}]  }
   0x1   :  { %s1293_s26 = smov 0   ;;  %s1295_s27 = smov 0  }
   0x2   :  { %s1297_s28 = smov 0  }
   0x3 LB: > { %s27_s29 = sadd.s32 1, %s1235_s26  ;;  %s30_s30 = sadd.s32 1, %s1239_s27  ;;  %s1243_s28 = sphi %s1297_s28, %s18_s28   ;;  %s1239_s27 = sphi %s1295_s27, %s1478_s27   ;;  %s1235_s26 = sphi %s1293_s26, %s1477_s26   ;;  %s1231_s25 = sphi %s1291_s25, %s1476_s25   ;;  %s1227_s24 = sphi %s1289_s24, %s1475_s24  }
   0x4   : > { %p28_p0 = scmp.ge.s32.totalorder %s27_s29, 2  ;;  %p967_p1 = scmp.ge.s32.totalorder %s1243_s28, 1 }
   0x5   : > { %p259_p2 = scmp.lt.s32.totalorder %s1243_s28, 5 }
   0x6   : > { %s1480_s29 = smov (%p28_p0, %s27_s29), 0  ;;  %s1482_s30 = smov (!%p28_p0, %s30_s30), %s1239_s27 }
   0x7   : > { %p260_p3 = pnand %p967_p1, %p259_p2  ;;  %p32_p4 = scmp.ge.s32.totalorder %s1482_s30, 2 }
   0x8   : > { %s968_s8 = sshll.u32 (!%p260_p3), %s1227_s24, 4  ;;  %p300_p5 = scmp.lt.s32.totalorder (!%p260_p3), %s1231_s25, 1 }
   0x9   : > { %s1484_s30 = smov (%p32_p4, %s1482_s30), 0  ;;  %263 = sbr.rel (%p260_p3) target bundleno = 766 (0x2fe), region = 44 }
   0xa   : > { %p302_p6 = scmp.lt.s32.totalorder (!%p260_p3), %s968_s8, 31  ;;  %p974_p7 = scmp.ne.s32.totalorder (!%p260_p3), %s1227_s24, 0 }
  0x10   : > { %s1486_s25 = smov (!%p300_p5, %s1231_s25), 1  ;;  %s1488_s8 = smov (!%p302_p6, %s968_s8), 31 }
  0x11   : > { %s969_s9 = sshll.u32 %s1486_s25, 5  ;;  %s1019_s10 = sshll.u32 %s1486_s25, 4  ;;  %v1245_v0 = vmov (!%p974_p7), 0.0  }
  0x12   : > { %s305_s11 = sadd.s32 %s969_s9, %s1488_s8  ;;  %s1325_s14 = scalar_lea.vmem %s1473_s6, %s1019_s10  ;;  %323 = vst [vmem:[#allocation2] sm:$0xff] (!%p974_p7), %v1245_v0 }
  0x13   : > { %s970_s15 = sshll.u32 %s305_s11, 2  ;;  %s973_s16 = sshll.u32 %s1486_s25, 3 }
  0x14   : > { %s1330_s19 = scalar_lea.vmem %s1467_s0, %s970_s15  ;;  %s1335_s22 = scalar_lea.vmem %s1474_s7, %s973_s16 }
  0x15   : > { %322 = sbr.rel (%p974_p7) target bundleno = 28 (0x1c), region = 48 }
  0x1c PF: > { %v1157_v1 = vld [vmem:[%s1468_s1] sm:$0xff]   ;;  %v1158_v2 = vld [vmem:[%s1468_s1 + $0x8] sm:$0xff]   ;;  %v1159_v3 = vld [vmem:[%s1468_s1 + $0x10] sm:$0xff]   ;;  %p991_p8 = scmp.ne.s32.totalorder %s1227_s24, 1 }
  0x1d   : > { %1045 = vmatprep.subr.bf16.mxu0 %v1157_v1  ;;  %1097 = vmatprep.subr.bf16.mxu1 %v1157_v1  ;;  %v1160_v4 = vld [vmem:[%s1468_s1 + $0x18] sm:$0xff]   ;;  %v1165_v5 = vld [vmem:[%s1330_s19] sm:$0xff]   ;;  %v1162_v8 = vld [vmem:[%s1468_s1 + $0x28] sm:$0xff]   ;;  %vm1247_vm0 = vmmov (!%p991_p8), 0  }
  0x1e   : > { %1046 = vmatpush3.bf16.msra.mxu0 %v1157_v1  ;;  %1105 = vmatpush3.bf16.msra.mxu1 %v1157_v1  ;;  %v1161_v6 = vld [vmem:[%s1468_s1 + $0x20] sm:$0xff]   ;;  %v1163_v9 = vld [vmem:[%s1468_s1 + $0x30] sm:$0xff]   ;;  %v1164_v10 = vld [vmem:[%s1468_s1 + $0x38] sm:$0xff]  }
  0x1f   : > { %1047 = vmatprep.subr.bf16.mxu0 %v1158_v2  ;;  %1098 = vmatprep.subr.bf16.mxu1 %v1158_v2  ;;  %v1169_v7 = vld [vmem:[%s1330_s19 + $0x20] sm:$0xff]   ;;  %v1166_v11 = vld [vmem:[%s1330_s19 + $0x8] sm:$0xff]   ;;  %v1167_v13 = vld [vmem:[%s1330_s19 + $0x10] sm:$0xff]  }
  0x20   : > { %1061 = vmatprep.mubr.bf16.mxu0 %v1165_v5  ;;  %1069 = vmatprep.mubr.bf16.mxu1 %v1169_v7  ;;  %v1170_v12 = vld [vmem:[%s1330_s19 + $0x28] sm:$0xff]   ;;  %v1171_v14 = vld [vmem:[%s1330_s19 + $0x30] sm:$0xff]   ;;  %v1168_v15 = vld [vmem:[%s1330_s19 + $0x18] sm:$0xff]  }
  0x21   : > { %v1172_v16 = vld [vmem:[%s1330_s19 + $0x38] sm:$0xff]   ;;  %v565_v5 = vld [vmem:[#allocation2] sm:$0xff] }
  0x22   : > { %1048 = vmatpush3.bf16.msra.mxu0 %v1158_v2  ;;  %1106 = vmatpush3.bf16.msra.mxu1 %v1158_v2 }
  0x23   : > { %1049 = vmatprep.subr.bf16.mxu0 %v1159_v3  ;;  %1099 = vmatprep.subr.bf16.mxu1 %v1159_v3 }
  0x26   : > { %1050 = vmatpush3.bf16.msra.mxu0 %v1159_v3  ;;  %1107 = vmatpush3.bf16.msra.mxu1 %v1159_v3 }
  0x27   : > { %1051 = vmatprep.subr.bf16.mxu0 %v1160_v4  ;;  %1100 = vmatprep.subr.bf16.mxu1 %v1160_v4 }
  0x2a   : > { %1052 = vmatpush3.bf16.msra.mxu0 %v1160_v4  ;;  %1108 = vmatpush3.bf16.msra.mxu1 %v1160_v4 }
  0x2b   : > { %1053 = vmatprep.subr.bf16.mxu0 %v1161_v6  ;;  %1101 = vmatprep.subr.bf16.mxu1 %v1161_v6 }
  0x2e   : > { %1054 = vmatpush3.bf16.msra.mxu0 %v1161_v6  ;;  %1109 = vmatpush3.bf16.msra.mxu1 %v1161_v6 }
  0x2f   : > { %1055 = vmatprep.subr.bf16.mxu0 %v1162_v8  ;;  %1102 = vmatprep.subr.bf16.mxu1 %v1162_v8 }
  0x32   : > { %1056 = vmatpush3.bf16.msra.mxu0 %v1162_v8  ;;  %1110 = vmatpush3.bf16.msra.mxu1 %v1162_v8  ;;  %v1173_v8 = vld [vmem:[%s1469_s2] sm:$0xff] (!%p991_p8)  }
  0x33   : > { %1057 = vmatprep.subr.bf16.mxu0 %v1163_v9  ;;  %1103 = vmatprep.subr.bf16.mxu1 %v1163_v9 }
  0x36   : > { %1058 = vmatpush3.bf16.msra.mxu0 %v1163_v9  ;;  %1111 = vmatpush3.bf16.msra.mxu1 %v1163_v9  ;;  %v1246_v9 = vmov (!%p991_p8), 0.0  }
  0x37   : > { %1059 = vmatprep.subr.bf16.mxu0 %v1164_v10  ;;  %1104 = vmatprep.subr.bf16.mxu1 %v1164_v10 }
  0x3a   : > { %1060 = vmatpush3.bf16.msra.mxu0 %v1164_v10  ;;  %1112 = vmatpush3.bf16.msra.mxu1 %v1164_v10  ;;  %v1174_v10 = vld [vmem:[%s1469_s2 + $0x8] sm:$0xff] (!%p991_p8)  }
  0x3b   : > { %1077 = vmatprep.subr.bf16.mxu0 (!%p991_p8), %v1246_v9 }
  0x3d   : > { %1062 = vmatmul.mubr.bf16.vlgmr.msra.gmra.mrb[0].mxu0 %v1166_v11  ;;  %1070 = vmatmul.mubr.bf16.vlgmr.msra.gmra.mrb[0].mxu1 %v1170_v12  ;;  %v1175_v11 = vld [vmem:[%s1469_s2 + $0x10] sm:$0xff] (!%p991_p8)   ;;  %v1181_v12 = vld [vmem:[%s1471_s4 + $0x4] ss:$8 sps:$4 sm:$0xff] (!%p991_p8)  }
  0x3e   : > { %1065 = vmatprep.mubr.bf16.mxu0 %v1167_v13  ;;  %1073 = vmatprep.mubr.bf16.mxu1 %v1171_v14  ;;  %v1183_v13 = vld [vmem:[%s1471_s4] ss:$8 sps:$4 sm:$0xff] (!%p991_p8)   ;;  %v1176_v14 = vld [vmem:[%s1469_s2 + $0x18] sm:$0xff] (!%p991_p8)  }
  0x3f   : > { %1078 = vmatpush3.bf16.msra.mxu0 (!%p991_p8), %v1173_v8  ;;  %817 = vmatprep.subr.bf16.mxu1 (!%p991_p8), %v1181_v12 }
  0x40   : > { %1079 = vmatprep.subr.bf16.mxu0 (!%p991_p8), %v1246_v9  ;;  %818 = vmatpush1.bf16.msra.mxu1 (!%p991_p8), %v1183_v13 }
  0x43   : > { %1080 = vmatpush3.bf16.msra.mxu0 (!%p991_p8), %v1174_v10 }
  0x44   : > { %1081 = vmatprep.subr.bf16.mxu0 (!%p991_p8), %v1246_v9 }
  0x45   : > { %1066 = vmatmul.mubr.bf16.gmra.mrb[4].mxu0 %v1168_v15  ;;  %1074 = vmatmul.mubr.bf16.gmra.mrb[4].mxu1 %v1172_v16  ;;  %v1184_v15 = vld [vmem:[%s1471_s4 + $0x14] ss:$8 sps:$4 sm:$0xff] (!%p991_p8)   ;;  %v1186_v16 = vld [vmem:[%s1471_s4 + $0x10] ss:$8 sps:$4 sm:$0xff] (!%p991_p8)  }
  0x46   : > { %1093 = vmatprep.mubr.msk.bf16.mxu0 (!%p991_p8), %vm1247_vm0, %v1246_v9  ;;  %819 = vmatprep.subr.bf16.mxu1 (!%p991_p8), %v1184_v15 }
  0x47   : > { %1082 = vmatpush3.bf16.msra.mxu0 (!%p991_p8), %v1175_v11  ;;  %820 = vmatpush1.bf16.msra.mxu1 (!%p991_p8), %v1186_v16 }
  0x48   : > { %1083 = vmatprep.subr.bf16.mxu0 (!%p991_p8), %v1246_v9 }
  0x4b   : > { %1084 = vmatpush3.bf16.msra.mxu0 (!%p991_p8), %v1176_v14 }
  0x4c   : > { %1085 = vmatprep.subr.bf16.mxu0 (!%p991_p8), %v1246_v9 }
 0x110   : > { %v1063_v17 = vpop.f32.mrb[0].mxu0  ;;  %v1071_v18 = vpop.f32.mrb[0].mxu1 }
 0x111   : > { %v486_v19 = vpop.f32.mrb[1].mxu0  ;;  %v518_v20 = vpop.f32.mrb[1].mxu1  ;;  %v551_v27 = vmax.f32 %v1063_v17, 0.0  ;;  %v559_v51 = vmax.f32 %v1071_v18, 0.0  ;;  %v1187_v17 = vld [vmem:[%s1471_s4 + $0x24] ss:$8 sps:$4 sm:$0xff] (!%p991_p8)  }
 0x112   : > { %v1064_v21 = vpop.f32.mrb[2].mxu0  ;;  %v1072_v22 = vpop.f32.mrb[2].mxu1  ;;  %v549_v25 = vmax.f32 %v486_v19, 0.0  ;;  %v557_v47 = vmax.f32 %v518_v20, 0.0  ;;  %v1177_v18 = vld [vmem:[%s1469_s2 + $0x20] sm:$0xff] (!%p991_p8)   ;;  %821 = vmatprep.subr.bf16.mxu1 (!%p991_p8), %v1187_v17 }
 0x113   : > { %v489_v23 = vpop.f32.mrb[3].mxu0  ;;  %v521_v24 = vpop.f32.mrb[3].mxu1  ;;  %v552_v29 = vmax.f32 %v1064_v21, 0.0  ;;  %v560_v53 = vmax.f32 %v1072_v22, 0.0  ;;  %v1189_v19 = vld [vmem:[%s1471_s4 + $0x20] ss:$8 sps:$4 sm:$0xff] (!%p991_p8)   ;;  %1086 = vmatpush3.bf16.msra.mxu0 (!%p991_p8), %v1177_v18 }
 0x114   : > { %v550_v26 = vmax.f32 %v489_v23, 0.0  ;;  %v558_v50 = vmax.f32 %v521_v24, 0.0  ;;  %v1190_v20 = vld [vmem:[%s1471_s4 + $0x34] ss:$8 sps:$4 sm:$0xff] (!%p991_p8)   ;;  %v1178_v21 = vld [vmem:[%s1469_s2 + $0x28] sm:$0xff] (!%p991_p8)   ;;  %1087 = vmatprep.subr.bf16.mxu0 (!%p991_p8), %v1246_v9  ;;  %822 = vmatpush1.bf16.msra.mxu1 (!%p991_p8), %v1189_v19 }
 0x115   : > { %v1192_v22 = vld [vmem:[%s1471_s4 + $0x30] ss:$8 sps:$4 sm:$0xff] (!%p991_p8)   ;;  %823 = vmatprep.subr.bf16.mxu1 (!%p991_p8), %v1190_v20  ;;  %v1193_v23 = vld [vmem:[%s1471_s4 + $0x44] ss:$8 sps:$4 sm:$0xff] (!%p991_p8)  }
 0x116   : > { %v566_v28 = vadd.f32 %v550_v26, %v549_v25  ;;  %v1179_v24 = vld [vmem:[%s1469_s2 + $0x30] sm:$0xff] (!%p991_p8)   ;;  %v1195_v26 = vld [vmem:[%s1471_s4 + $0x40] ss:$8 sps:$4 sm:$0xff] (!%p991_p8)  }
 0x117   : > { %1088 = vmatpush3.bf16.msra.mxu0 (!%p991_p8), %v1178_v21 }
 0x118   : > { %v567_v30 = vadd.f32 %v566_v28, %v551_v27  ;;  %v1067_v31 = vpop.f32.mrb[4].mxu0  ;;  %v1075_v32 = vpop.f32.mrb[4].mxu1  ;;  %1089 = vmatprep.subr.bf16.mxu0 (!%p991_p8), %v1246_v9  ;;  %824 = vmatpush1.bf16.msra.mxu1 (!%p991_p8), %v1192_v22  ;;  %v1196_v28 = vld [vmem:[%s1471_s4 + $0x54] ss:$8 sps:$4 sm:$0xff] (!%p991_p8)  }
 0x119   : > { %v502_v33 = vpop.f32.mrb[5].mxu0  ;;  %v534_v34 = vpop.f32.mrb[5].mxu1  ;;  %v555_v43 = vmax.f32 %v1067_v31, 0.0  ;;  %v563_v59 = vmax.f32 %v1075_v32, 0.0  ;;  %825 = vmatprep.subr.bf16.mxu1 (!%p991_p8), %v1193_v23  ;;  %v1199_v32 = vld [vmem:[%s1471_s4 + $0x64] ss:$8 sps:$4 sm:$0xff] (!%p991_p8)  }
 0x11a   : > { %v553_v35 = vmax.f32 %v502_v33, 0.0  ;;  %v568_v36 = vadd.f32 %v567_v30, %v552_v29  ;;  %v1068_v37 = vpop.f32.mrb[6].mxu0  ;;  %v1076_v38 = vpop.f32.mrb[6].mxu1  ;;  %v561_v55 = vmax.f32 %v534_v34, 0.0  ;;  %v1180_v29 = vld [vmem:[%s1469_s2 + $0x38] sm:$0xff] (!%p991_p8)  }
 0x11b   : > { %v505_v39 = vpop.f32.mrb[7].mxu0  ;;  %v537_v40 = vpop.f32.mrb[7].mxu1  ;;  %v556_v45 = vmax.f32 %v1068_v37, 0.0  ;;  %v564_v61 = vmax.f32 %v1076_v38, 0.0  ;;  %1090 = vmatpush3.bf16.msra.mxu0 (!%p991_p8), %v1179_v24  ;;  %v1198_v30 = vld [vmem:[%s1471_s4 + $0x50] ss:$8 sps:$4 sm:$0xff] (!%p991_p8)  }
 0x11c   : > { %v569_v41 = vadd.f32 %v568_v36, %v553_v35  ;;  %v554_v42 = vmax.f32 %v505_v39, 0.0  ;;  %v562_v58 = vmax.f32 %v537_v40, 0.0  ;;  %1091 = vmatprep.subr.bf16.mxu0 (!%p991_p8), %v1246_v9  ;;  %826 = vmatpush1.bf16.msra.mxu1 (!%p991_p8), %v1195_v26  ;;  %v1201_v33 = vld [vmem:[%s1471_s4 + $0x60] ss:$8 sps:$4 sm:$0xff] (!%p991_p8)   ;;  %v1202_v34 = vld [vmem:[%s1471_s4 + $0x74] ss:$8 sps:$4 sm:$0xff] (!%p991_p8)  }
 0x11d   : > { %827 = vmatprep.subr.bf16.mxu1 (!%p991_p8), %v1196_v28  ;;  %v1204_v35 = vld [vmem:[%s1471_s4 + $0x70] ss:$8 sps:$4 sm:$0xff] (!%p991_p8)   ;;  %v1248_v36 = vmov (!%p991_p8), 0   ;;  %v992_v37 = vld [vmem:[%s1470_s3] ss:$0 sm:$0xff] (!%p991_p8) }
 0x11e   : > { %v570_v44 = vadd.f32 %v569_v41, %v554_v42  ;;  %849 = vmatprep.mubr.bf16.mxu1 (!%p991_p8), %v1248_v36 }
 0x11f   : > { %1092 = vmatpush3.bf16.msra.mxu0 (!%p991_p8), %v1180_v29 }
 0x120   : > { %v571_v46 = vadd.f32 %v570_v44, %v555_v43  ;;  %828 = vmatpush1.bf16.msra.mxu1 (!%p991_p8), %v1198_v30  ;;  %v727_v44 = vlaneseq (!%p991_p8) }
 0x121   : > { %829 = vmatprep.subr.bf16.mxu1 (!%p991_p8), %v1199_v32 }
 0x122   : > { %v572_v48 = vadd.f32 %v571_v46, %v556_v45  ;;  %v728_v45 = vshrl.u32 (!%p991_p8), %v727_v44, 7 }
 0x124   : > { %v573_v49 = vadd.f32 %v572_v48, %v557_v47  ;;  %830 = vmatpush1.bf16.msra.mxu1 (!%p991_p8), %v1201_v33  ;;  %v729_v46 = vsub.s32 (!%p991_p8), 0, %v728_v45  ;;  %v725_v47 = vld [vmem:[%s1472_s5] sm:$0x3] (!%p991_p8)  ;;  %v733_v48 = vsub.s32 (!%p991_p8), 1, %v728_v45 }
 0x125   : > { %831 = vmatprep.subr.bf16.mxu1 (!%p991_p8), %v1202_v34 }
 0x126   : > { %v574_v52 = vadd.f32 %v573_v49, %v558_v50  ;;  %v730_v49 = vrot.slane (!%p991_p8), %v725_v47, %v729_v46  ;;  %v734_v50 = vrot.slane (!%p991_p8), %v725_v47, %v733_v48 }
 0x128   : > { %v575_v54 = vadd.f32 %v574_v52, %v559_v51  ;;  %832 = vmatpush1.bf16.msra.mxu1 (!%p991_p8), %v1204_v35 }
 0x12a   : > { %v576_v56 = vadd.f32 %v575_v54, %v560_v53 }
 0x12c   : > { %v577_v57 = vadd.f32 %v576_v56, %v561_v55 }
 0x12e   : > { %v578_v60 = vadd.f32 %v577_v57, %v562_v58 }
 0x130   : > { %v579_v62 = vadd.f32 %v578_v60, %v563_v59 }
 0x132   : > { %v580_v63 = vadd.f32 %v579_v62, %v564_v61 }
 0x134   : > { %v581_v0 = vrot.slane %v580_v63, 4 }
 0x136   : > { %v582_v1 = vadd.f32 %v581_v0, %v580_v63 }
 0x138   : > { %v583_v2 = vrot.slane %v582_v1, 2 }
 0x13a   : > { %v584_v3 = vadd.f32 %v583_v2, %v582_v1 }
 0x13c   : > { %v585_v4 = vrot.slane %v584_v3, 1  ;;  %592 = sbr.rel (%p991_p8) target bundleno = 766 (0x2fe), region = 52 }
 0x13e   : > { %v586_v6 = vadd.f32 %v585_v4, %v584_v3 }
 0x140   : > { %v587_v7 = vadd.f32 %v586_v6, %v565_v5 }
 0x142   : > { %588 = vst [vmem:[#allocation2] sm:$0xff] %v587_v7 }
 0x149   : > { %v593_v25 = vld [vmem:[#allocation2] sm:$0xff] }
 0x14a   : > { %v594_v27 = vmul.f32 0.00390625, %v593_v25 }
 0x14c   : > { %v595_v31 = vpack.c.bf16 %v594_v27, %v594_v27 }
 0x14e   : > { %1094 = vmatmul.mubr.bf16.vlgmr.msra.gmra.mrb[0].mxu0 %v595_v31 }
 0x221   : > { %v701_v38 = vpop.f32.mrb[0].mxu0 }
 0x222   : > { %v702_v39 = vadd.f32 %v992_v37, %v701_v38  ;;  %v1095_v40 = vpop.f32.mrb[1].mxu0 }
 0x223   : > { %v704_v41 = vpop.f32.mrb[2].mxu0 }
 0x224   : > { %707 = vst [vmem:[%s1335_s22] sm:$0xff] %v702_v39  ;;  %v708_v42 = vpack.c.bf16 %v702_v39, %v702_v39  ;;  %v1096_v43 = vpop.f32.mrb[3].mxu0 }
 0x226   : > { %850 = vmatmul.mubr.bf16.vlgmr.msra.gmra.mrb[0].mxu1 %v708_v42 }
 0x2f9   : > { %v851_v51 = vpop.f32.mrb[0].mxu1 }
 0x2fa   : > { %v852_v52 = vadd.f32 %v851_v51, %v730_v49  ;;  %v853_v53 = vpop.f32.mrb[1].mxu1 }
 0x2fb   : > { %v854_v54 = vadd.f32 %v853_v53, %v734_v50  ;;  %v855_v55 = vpop.f32.mrb[2].mxu1 }
 0x2fc   : > { %858 = vst [vmem:[%s1325_s14] sm:$0xff] %v852_v52  ;;  %v856_v56 = vpop.f32.mrb[3].mxu1 }
 0x2fd   : > { %859 = vst [vmem:[%s1325_s14 + $0x8] sm:$0xff] %v854_v54 }
 0x2fe PF: > { %s18_s28 = sadd.s32 1, %s1243_s28   ;;  %s1475_s24 = smov %s1235_s26 }
 0x2ff   : > { %p15_p9 = scmp.ge.s32.totalorder %s18_s28, 6   ;;  %s1476_s25 = smov %s1239_s27 }
 0x300   : > { %s1477_s26 = smov %s1480_s29  ;;  %s1478_s27 = smov %s1484_s30 }
 0x301   :  { %17 = sbr.rel (!%p15_p9) target bundleno = 3 (0x3), region = 94 }

</bundles_post_ra>
